<compile_context>
chip_gen: v6e
topology: v6e:2x2x1
jax: 0.10.0
libtpu: 0.0.40
codegen_flags: <defaults>
</compile_context>

<pallas_src>
import functools
import math

import jax
import jax.numpy as jnp
from jax.experimental import pallas as pl
from jax.experimental.pallas import tpu as pltpu

_LANE = 128  # vreg lane width / MXU-friendly feature pad


# ---------------------------------------------------------------------------
# helpers
# ---------------------------------------------------------------------------
def _round_up(x, m):
    return (x + m - 1) // m * m


def _pad2(a, rows, cols):
    return jnp.pad(a, ((0, rows - a.shape[0]), (0, cols - a.shape[1])))


def _pick_contraction_tile(fin_p):
    """Contraction tile for the x @ W0 pre-pass (fin_p is a multiple of 128)."""
    if fin_p <= 512:
        return fin_p
    for c in (512, 256, 128):
        if fin_p % c == 0:
            return c
    return 128


@functools.lru_cache(maxsize=None)
def _hw_params():
    """Returns (vmem_capacity_bytes, scoped_vmem_limit_bytes, two_tensorcores)."""
    kind = ""
    try:
        kind = jax.devices()[0].device_kind.lower()
    except Exception:
        pass
    two_tc = "v7" in kind                       # v7x: 2 TensorCores / chip
    cap = (64 << 20) if two_tc else (128 << 20)  # 64 MiB/TC on v7x, 128 on v5e/v6e
    try:
        cap = int(pltpu.get_tpu_info().vmem_capacity_bytes)
    except Exception:
        pass
    # Leave headroom for compiler scratch + double buffers:
    #   ~38 MiB on v7x (64 MiB/TC), ~77 MiB on v5e/v6e (128 MiB).
    limit = max(32 << 20, min(int(cap * 0.6), 80 << 20))
    return cap, limit, two_tc


def _fused_vmem_estimate(n, dims):
    """Rough VMEM footprint (bytes) of the fully-fused single-kernel path."""
    np_ = _round_up(n, _LANE)
    pdims = [_round_up(d, _LANE) for d in dims]
    fmax = max(pdims)
    est = 2 * np_ * np_                                   # adj (bf16, resident)
    est += 2 * np_ * pdims[0]                             # x   (bf16)
    est += sum(2 * pdims[i] * pdims[i + 1] for i in range(len(pdims) - 1))
    est += 3 * 4 * np_ * fmax                             # live f32 activations
    est += 4 * np_ * pdims[-1]                            # f32 output
    return est


# ---------------------------------------------------------------------------
# Kernels
# ---------------------------------------------------------------------------
def _fused_gcn_kernel(x_ref, adj_ref, *rest, num_layers, out_valid):
    """Whole GCN forward (all layers + masked log_softmax) in one kernel."""
    w_refs = rest[:num_layers]
    o_ref = rest[num_layers]

    adj = adj_ref[...]                       # bf16 [Np, Np] (stays VMEM-resident)
    t = x_ref[...]                           # bf16 [Np, F0p]
    for w_ref in w_refs:
        xw = jnp.dot(t.astype(jnp.bfloat16), w_ref[...],
                     preferred_element_type=jnp.float32)           # MXU
        h = jnp.dot(adj, xw.astype(jnp.bfloat16),
                    preferred_element_type=jnp.float32)            # MXU
        t = jnp.maximum(h, 0.0)                                    # VPU relu (f32)

    # masked log_softmax over the valid (unpadded) output columns
    col = jax.lax.broadcasted_iota(jnp.int32, t.shape, 1)
    valid = col < out_valid
    z = jnp.where(valid, t, -1e30)
    m = jnp.max(z, axis=1, keepdims=True)
    s = z - m
    e = jnp.where(valid, jnp.exp(s), 0.0)
    lse = jnp.log(jnp.sum(e, axis=1, keepdims=True))
    o_ref[...] = (s - lse).astype(o_ref.dtype)


def _xw_kernel(x_ref, w_ref, o_ref, acc_ref):
    """Row/contraction-tiled t0 = x @ W0 (bf16 in, f32 accumulate, bf16 out)."""
    @pl.when(pl.program_id(1) == 0)
    def _():
        acc_ref[...] = jnp.zeros_like(acc_ref)

    acc_ref[...] += jnp.dot(x_ref[...], w_ref[...],
                            preferred_element_type=jnp.float32)

    @pl.when(pl.program_id(1) == pl.num_programs(1) - 1)
    def _():
        o_ref[...] = acc_ref[...].astype(o_ref.dtype)


def _adj_mm_relu_w_kernel(adj_ref, t_ref, w_ref, o_ref, acc_ref):
    """Tiled relu(adj @ t) with f32 accumulator; finalize fuses the NEXT
    layer's x@W: o = (relu(acc).bf16) @ W_next.  Kills one HBM round trip of
    the [N, F] intermediate per layer; the extra dot rides the MXU slot."""
    @pl.when(pl.program_id(1) == 0)
    def _():
        acc_ref[...] = jnp.zeros_like(acc_ref)

    acc_ref[...] += jnp.dot(adj_ref[...], t_ref[...],
                            preferred_element_type=jnp.float32)

    @pl.when(pl.program_id(1) == pl.num_programs(1) - 1)
    def _():
        a = jnp.maximum(acc_ref[...], 0.0).astype(jnp.bfloat16)
        o_ref[...] = jnp.dot(a, w_ref[...],
                             preferred_element_type=jnp.float32).astype(o_ref.dtype)


def _adj_mm_relu_logsoftmax_kernel(adj_ref, t_ref, o_ref, acc_ref, *, out_valid):
    """Last layer: tiled relu(adj @ t); finalize fuses the masked log_softmax
    (exp/log land on the EUP slot, effectively free under the MXU-bound loop),
    so the f32 logits never round-trip HBM."""
    @pl.when(pl.program_id(1) == 0)
    def _():
        acc_ref[...] = jnp.zeros_like(acc_ref)

    acc_ref[...] += jnp.dot(adj_ref[...], t_ref[...],
                            preferred_element_type=jnp.float32)

    @pl.when(pl.program_id(1) == pl.num_programs(1) - 1)
    def _():
        h = jnp.maximum(acc_ref[...], 0.0)
        col = jax.lax.broadcasted_iota(jnp.int32, h.shape, 1)
        valid = col < out_valid
        z = jnp.where(valid, h, -1e30)
        m = jnp.max(z, axis=1, keepdims=True)
        s = z - m
        e = jnp.where(valid, jnp.exp(s), 0.0)
        lse = jnp.log(jnp.sum(e, axis=1, keepdims=True))
        o_ref[...] = (s - lse).astype(o_ref.dtype)


# ---------------------------------------------------------------------------
# Fused path (small graphs -- adj / weights / activations VMEM-resident)
# ---------------------------------------------------------------------------
@jax.jit
def gcn_forward_fused(x, adj, weights):
    _, vmem_limit, _ = _hw_params()
    n, f0 = x.shape
    out_dim = weights[-1].shape[1]
    num_layers = len(weights)

    np_ = _round_up(n, _LANE)
    dims = [f0] + [w.shape[1] for w in weights]
    pdims = [_round_up(d, _LANE) for d in dims]

    x_p = _pad2(x, np_, pdims[0]).astype(jnp.bfloat16)
    adj_p = _pad2(adj, np_, np_).astype(jnp.bfloat16)
    w_p = [_pad2(w, pdims[i], pdims[i + 1]).astype(jnp.bfloat16)
           for i, w in enumerate(weights)]

    flops = 0
    for i in range(num_layers):
        flops += 2 * np_ * pdims[i] * pdims[i + 1]      # x @ W
        flops += 2 * np_ * np_ * pdims[i + 1]           # adj @ (xW)
    bytes_accessed = (x_p.size + adj_p.size + sum(w.size for w in w_p)) * 2 \
        + np_ * pdims[-1] * 4

    kernel = functools.partial(_fused_gcn_kernel,
                               num_layers=num_layers, out_valid=out_dim)

    out_p = pl.pallas_call(
        kernel,
        out_shape=jax.ShapeDtypeStruct((np_, pdims[-1]), jnp.float32),
        grid=(1,),
        in_specs=[pl.BlockSpec((np_, pdims[0]), lambda i: (0, 0)),
                  pl.BlockSpec((np_, np_), lambda i: (0, 0))]
                 + [pl.BlockSpec(wp.shape, lambda i: (0, 0)) for wp in w_p],
        out_specs=pl.BlockSpec((np_, pdims[-1]), lambda i: (0, 0)),
        compiler_params=pltpu.CompilerParams(
            dimension_semantics=("arbitrary",),
            vmem_limit_bytes=vmem_limit),
        cost_estimate=pl.CostEstimate(flops=int(flops),
                                      transcendentals=int(np_ * pdims[-1]),
                                      bytes_accessed=int(bytes_accessed)),
    )(x_p, adj_p, *w_p)
    return out_p[:n, :out_dim]


# ---------------------------------------------------------------------------
# Tiled path (large graphs)
# ---------------------------------------------------------------------------
def _matmul_x_w(x_p, w_p, tm, vmem_limit):
    np_, fin = x_p.shape
    fout = w_p.shape[1]
    ck = _pick_contraction_tile(fin)
    return pl.pallas_call(
        _xw_kernel,
        out_shape=jax.ShapeDtypeStruct((np_, fout), jnp.bfloat16),
        grid=(np_ // tm, fin // ck),
        in_specs=[pl.BlockSpec((tm, ck), lambda i, k: (i, k)),
                  pl.BlockSpec((ck, fout), lambda i, k: (k, 0))],
        out_specs=pl.BlockSpec((tm, fout), lambda i, k: (i, 0)),
        scratch_shapes=[pltpu.VMEM((tm, fout), jnp.float32)],
        compiler_params=pltpu.CompilerParams(
            dimension_semantics=("parallel", "arbitrary"),
            vmem_limit_bytes=vmem_limit),
    )(x_p, w_p)


def _adj_mm_relu_w(adj_p, t_p, w_next_p, tm, tk, vmem_limit):
    np_ = adj_p.shape[0]
    f_cur = t_p.shape[1]
    f_next = w_next_p.shape[1]
    flops = 2 * np_ * np_ * f_cur + 2 * np_ * f_cur * f_next
    bytes_accessed = (adj_p.size * 2 + t_p.size * 2 * (np_ // tm)
                      + w_next_p.size * 2 + np_ * f_next * 2)
    return pl.pallas_call(
        _adj_mm_relu_w_kernel,
        out_shape=jax.ShapeDtypeStruct((np_, f_next), jnp.bfloat16),
        grid=(np_ // tm, np_ // tk),
        in_specs=[pl.BlockSpec((tm, tk), lambda i, k: (i, k)),
                  pl.BlockSpec((tk, f_cur), lambda i, k: (k, 0)),
                  # W_next: constant index map -> fetched once, VMEM-resident
                  pl.BlockSpec((f_cur, f_next), lambda i, k: (0, 0))],
        out_specs=pl.BlockSpec((tm, f_next), lambda i, k: (i, 0)),
        scratch_shapes=[pltpu.VMEM((tm, f_cur), jnp.float32)],
        compiler_params=pltpu.CompilerParams(
            dimension_semantics=("parallel", "arbitrary"),
            vmem_limit_bytes=vmem_limit),
        cost_estimate=pl.CostEstimate(flops=int(flops),
                                      transcendentals=0,
                                      bytes_accessed=int(bytes_accessed)),
    )(adj_p, t_p, w_next_p)


def _adj_mm_relu_logsoftmax(adj_p, t_p, tm, tk, out_valid, vmem_limit):
    np_ = adj_p.shape[0]
    f_cur = t_p.shape[1]
    flops = 2 * np_ * np_ * f_cur
    bytes_accessed = (adj_p.size * 2 + t_p.size * 2 * (np_ // tm)
                      + np_ * f_cur * 4)
    return pl.pallas_call(
        functools.partial(_adj_mm_relu_logsoftmax_kernel, out_valid=out_valid),
        out_shape=jax.ShapeDtypeStruct((np_, f_cur), jnp.float32),
        grid=(np_ // tm, np_ // tk),
        in_specs=[pl.BlockSpec((tm, tk), lambda i, k: (i, k)),
                  pl.BlockSpec((tk, f_cur), lambda i, k: (k, 0))],
        out_specs=pl.BlockSpec((tm, f_cur), lambda i, k: (i, 0)),
        scratch_shapes=[pltpu.VMEM((tm, f_cur), jnp.float32)],
        compiler_params=pltpu.CompilerParams(
            dimension_semantics=("parallel", "arbitrary"),
            vmem_limit_bytes=vmem_limit),
        cost_estimate=pl.CostEstimate(flops=int(flops),
                                      transcendentals=int(np_ * f_cur),
                                      bytes_accessed=int(bytes_accessed)),
    )(adj_p, t_p)


@functools.partial(jax.jit, static_argnames=("tm", "tk"))
def gcn_forward_tiled(x, adj, weights, *, tm=512, tk=512):
    _, vmem_limit, _ = _hw_params()
    n, f0 = x.shape
    out_dim = weights[-1].shape[1]
    num_layers = len(weights)

    # Cap tiles for small graphs so padding never exceeds the next 128/tile
    # multiple (avoids gratuitous zero rows/cols of adj traffic).
    np128 = _round_up(n, _LANE)
    tm = min(tm, np128)
    tk = min(tk, np128)
    np_ = _round_up(np128, math.lcm(tm, tk))

    dims = [f0] + [w.shape[1] for w in weights]
    pdims = [_round_up(d, _LANE) for d in dims]

    adj_p = _pad2(adj, np_, np_).astype(jnp.bfloat16)
    x_p = _pad2(x, np_, pdims[0]).astype(jnp.bfloat16)
    w_p = [_pad2(w, pdims[i], pdims[i + 1]).astype(jnp.bfloat16)
           for i, w in enumerate(weights)]

    # Layer-0 pre-pass: t = x @ W0 (the only x@W that can't be fused into a
    # preceding adj matmul).
    t = _matmul_x_w(x_p, w_p[0], tm, vmem_limit)

    # One pallas_call per layer: relu(adj @ t) with the next layer's x@W
    # (or the final log_softmax) fused into the accumulator finalize.
    for li in range(num_layers):
        if li < num_layers - 1:
            t = _adj_mm_relu_w(adj_p, t, w_p[li + 1], tm, tk, vmem_limit)
        else:
            t = _adj_mm_relu_logsoftmax(adj_p, t, tm, tk, out_dim, vmem_limit)

    return t[:n, :out_dim]


def gcn_forward(x, adj, weights, *, tm=512, tk=512):
    """Dispatch: fused single-kernel path when the whole problem fits VMEM
    (adj-resident; best on 1-TC v5e/v6e), otherwise the 2-TC-shardable tiled
    path (always for medium/large graphs on v7x)."""
    _, vmem_limit, two_tc = _hw_params()
    n = x.shape[0]
    dims = [x.shape[1]] + [w.shape[1] for w in weights]
    n_cap = 512 if two_tc else 2048   # v7x: prefer 2-TC tiled path for medium N
    if n <= n_cap and _fused_vmem_estimate(n, dims) <= int(0.7 * vmem_limit):
        return gcn_forward_fused(x, adj, weights)
    return gcn_forward_tiled(x, adj, weights, tm=tm, tk=tk)


# ---------------------------------------------------------------------------
# Params + reference
# ---------------------------------------------------------------------------
def init_gcn_params(key, in_dim, out_dim, hid_dim, num_layers):
    """Mirrors GraphConvolution.reset_parameters: uniform(-stdv, stdv),
    stdv = sqrt(6/(fan_in + fan_out)), no bias."""
    dims = [in_dim, hid_dim] + [hid_dim] * (num_layers - 2) + [out_dim]
    weights = []
    for li in range(num_layers):
        key, sub = jax.random.split(key)
        fin, fout = dims[li], dims[li + 1]
        stdv = jnp.sqrt(6.0 / (fin + fout))
        weights.append(jax.random.uniform(sub, (fin, fout), dtype=jnp.float32,
                                          minval=-stdv, maxval=stdv))
    return weights


def gcn_forward_ref(x, adj, weights):
    """Pure-JAX reference mirroring the kernels' bf16-input / f32-accumulate math."""
    bf = jnp.bfloat16
    adj_b = adj.astype(bf)
    t = x.astype(bf)
    h = None
    for w in weights:
        xw = jnp.dot(t, w.astype(bf), preferred_element_type=jnp.float32).astype(bf)
        h = jnp.maximum(jnp.dot(adj_b, xw, preferred_element_type=jnp.float32), 0.0)
        t = h.astype(bf)
    return jax.nn.log_softmax(h, axis=1)


def _make_graph(key, n, in_dim):
    k_x, k_a = jax.random.split(key)
    x = jax.random.normal(k_x, (n, in_dim), dtype=jnp.float32)
    a = (jax.random.uniform(k_a, (n, n)) > 0.5).astype(jnp.float32)
    a = jnp.maximum(a, a.T) + jnp.eye(n, dtype=jnp.float32)
    adj = a / jnp.sum(a, axis=1, keepdims=True)
    return x, adj


# TODO(synk): dropout (p=0.0 in the spec) is an inference no-op and is not implemented.
# ---------------------------------------------------------------------------
if __name__ == "__main__":
    key = jax.random.PRNGKey(0)

    # --- small graph: fused single-kernel path (via dispatcher) -------------
    N, in_dim, hid_dim, out_dim, num_layers = 64, 16, 32, 8, 3
    k_g, k_w, k_g2, k_w2 = jax.random.split(key, 4)
    x, adj = _make_graph(k_g, N, in_dim)
    weights = init_gcn_params(k_w, in_dim, out_dim, hid_dim, num_layers)

    out = gcn_forward(x, adj, weights)
    out = jax.block_until_ready(out)
    ref = gcn_forward_ref(x, adj, weights)
    assert out.shape == (N, out_dim)
    assert jnp.allclose(out, ref, atol=1e-2, rtol=1e-2), "fused path mismatch"

    # --- ragged, multi-tile graph: tiled accumulator path --------------------
    # N2=1000 -> padded to 1024, grid (2, 2) with 512x512 tiles: exercises the
    # contraction accumulator, the fused next-layer x@W, and the fused masked
    # log_softmax on the ragged edge.
    N2, in2, hid2, out2 = 1000, 96, 192, 40
    x2, adj2 = _make_graph(k_g2, N2, in2)
    weights2 = init_gcn_params(k_w2, in2, out2, hid2, num_layers)

    out_t = gcn_forward_tiled(x2, adj2, weights2, tm=512, tk=512)
    out_t = jax.block_until_ready(out_t)
    ref_t = gcn_forward_ref(x2, adj2, weights2)
    assert out_t.shape == (N2, out2)
    assert jnp.allclose(out_t, ref_t, atol=1e-2, rtol=1e-2), "tiled path mismatch"

    print("KERNEL_OK")
</pallas_src>

<mosaic_0001>
module attributes {stable_mosaic.version = 11 : i64} {
  func.func @_fused_gcn_kernel(%arg0: i32, %arg1: memref<128x128xbf16, #tpu.memory_space<vmem>>, %arg2: memref<128x128xbf16, #tpu.memory_space<vmem>>, %arg3: memref<128x128xbf16, #tpu.memory_space<vmem>>, %arg4: memref<128x128xbf16, #tpu.memory_space<vmem>>, %arg5: memref<128x128xbf16, #tpu.memory_space<vmem>>, %arg6: memref<128x128xf32, #tpu.memory_space<vmem>>) attributes {dimension_semantics = [#tpu.dimension_semantics<arbitrary>], iteration_bounds = array<i64: 1>, scalar_prefetch = 0 : i64, scratch_operands = 0 : i64, tpu.core_type = #tpu.core_type<tc>, window_params = [{pipeline_mode = #tpu.pipeline_mode<synchronous>, transform_indices = @transform_0, window_bounds = array<i64: 128, 128>}, {pipeline_mode = #tpu.pipeline_mode<synchronous>, transform_indices = @transform_1, window_bounds = array<i64: 128, 128>}, {pipeline_mode = #tpu.pipeline_mode<synchronous>, transform_indices = @transform_2, window_bounds = array<i64: 128, 128>}, {pipeline_mode = #tpu.pipeline_mode<synchronous>, transform_indices = @transform_3, window_bounds = array<i64: 128, 128>}, {pipeline_mode = #tpu.pipeline_mode<synchronous>, transform_indices = @transform_4, window_bounds = array<i64: 128, 128>}, {pipeline_mode = #tpu.pipeline_mode<synchronous>, transform_indices = @transform_5, window_bounds = array<i64: 128, 128>}]} {
    %c0 = arith.constant 0 : index
    %c0_0 = arith.constant 0 : index
    %0 = vector.load %arg2[%c0, %c0_0] : memref<128x128xbf16, #tpu.memory_space<vmem>>, vector<128x128xbf16>
    %c0_1 = arith.constant 0 : index
    %c0_2 = arith.constant 0 : index
    %1 = vector.load %arg1[%c0_1, %c0_2] : memref<128x128xbf16, #tpu.memory_space<vmem>>, vector<128x128xbf16>
    %c0_3 = arith.constant 0 : index
    %c0_4 = arith.constant 0 : index
    %2 = vector.load %arg3[%c0_3, %c0_4] : memref<128x128xbf16, #tpu.memory_space<vmem>>, vector<128x128xbf16>
    %cst = arith.constant dense<0.000000e+00> : vector<128x128xf32>
    %3 = tpu.matmul %1, %2, %cst {dimension_numbers = #tpu.dot_dimension_numbers<[1], [0], [0], [1], [0, 0, 1, 1], [], []>} : vector<128x128xbf16>, vector<128x128xbf16>, vector<128x128xf32> -> vector<128x128xf32>
    %4 = arith.truncf %3 : vector<128x128xf32> to vector<128x128xbf16>
    %cst_5 = arith.constant dense<0.000000e+00> : vector<128x128xf32>
    %5 = tpu.matmul %0, %4, %cst_5 {dimension_numbers = #tpu.dot_dimension_numbers<[1], [0], [0], [1], [0, 0, 1, 1], [], []>} : vector<128x128xbf16>, vector<128x128xbf16>, vector<128x128xf32> -> vector<128x128xf32>
    %cst_6 = arith.constant 0.000000e+00 : f32
    %6 = vector.broadcast %cst_6 : f32 to vector<128x128xf32>
    %7 = arith.maximumf %5, %6 : vector<128x128xf32>
    %8 = arith.truncf %7 : vector<128x128xf32> to vector<128x128xbf16>
    %c0_7 = arith.constant 0 : index
    %c0_8 = arith.constant 0 : index
    %9 = vector.load %arg4[%c0_7, %c0_8] : memref<128x128xbf16, #tpu.memory_space<vmem>>, vector<128x128xbf16>
    %cst_9 = arith.constant dense<0.000000e+00> : vector<128x128xf32>
    %10 = tpu.matmul %8, %9, %cst_9 {dimension_numbers = #tpu.dot_dimension_numbers<[1], [0], [0], [1], [0, 0, 1, 1], [], []>} : vector<128x128xbf16>, vector<128x128xbf16>, vector<128x128xf32> -> vector<128x128xf32>
    %11 = arith.truncf %10 : vector<128x128xf32> to vector<128x128xbf16>
    %cst_10 = arith.constant dense<0.000000e+00> : vector<128x128xf32>
    %12 = tpu.matmul %0, %11, %cst_10 {dimension_numbers = #tpu.dot_dimension_numbers<[1], [0], [0], [1], [0, 0, 1, 1], [], []>} : vector<128x128xbf16>, vector<128x128xbf16>, vector<128x128xf32> -> vector<128x128xf32>
    %cst_11 = arith.constant 0.000000e+00 : f32
    %13 = vector.broadcast %cst_11 : f32 to vector<128x128xf32>
    %14 = arith.maximumf %12, %13 : vector<128x128xf32>
    %15 = arith.truncf %14 : vector<128x128xf32> to vector<128x128xbf16>
    %c0_12 = arith.constant 0 : index
    %c0_13 = arith.constant 0 : index
    %16 = vector.load %arg5[%c0_12, %c0_13] : memref<128x128xbf16, #tpu.memory_space<vmem>>, vector<128x128xbf16>
    %cst_14 = arith.constant dense<0.000000e+00> : vector<128x128xf32>
    %17 = tpu.matmul %15, %16, %cst_14 {dimension_numbers = #tpu.dot_dimension_numbers<[1], [0], [0], [1], [0, 0, 1, 1], [], []>} : vector<128x128xbf16>, vector<128x128xbf16>, vector<128x128xf32> -> vector<128x128xf32>
    %18 = arith.truncf %17 : vector<128x128xf32> to vector<128x128xbf16>
    %cst_15 = arith.constant dense<0.000000e+00> : vector<128x128xf32>
    %19 = tpu.matmul %0, %18, %cst_15 {dimension_numbers = #tpu.dot_dimension_numbers<[1], [0], [0], [1], [0, 0, 1, 1], [], []>} : vector<128x128xbf16>, vector<128x128xbf16>, vector<128x128xf32> -> vector<128x128xf32>
    %cst_16 = arith.constant 0.000000e+00 : f32
    %20 = vector.broadcast %cst_16 : f32 to vector<128x128xf32>
    %21 = arith.maximumf %19, %20 : vector<128x128xf32>
    %22 = tpu.iota {dimensions = array<i32: 1>} : vector<128x128xi32>
    %c8_i32 = arith.constant 8 : i32
    %23 = vector.broadcast %c8_i32 : i32 to vector<128x128xi32>
    %24 = arith.cmpi slt, %22, %23 : vector<128x128xi32>
    %cst_17 = arith.constant -1.000000e+30 : f32
    %25 = vector.broadcast %cst_17 : f32 to vector<128x128xf32>
    %26 = arith.select %24, %21, %25 : vector<128x128xi1>, vector<128x128xf32>
    %cst_18 = arith.constant dense<0xFF800000> : vector<128xf32>
    %27 = vector.multi_reduction <maximumf>, %26, %cst_18 [1] : vector<128x128xf32> to vector<128xf32>
    %28 = vector.shape_cast %27 : vector<128xf32> to vector<128x1xf32>
    %29 = vector.broadcast %28 : vector<128x1xf32> to vector<128x128xf32>
    %30 = arith.subf %26, %29 : vector<128x128xf32>
    %31 = math.exp %30 : vector<128x128xf32>
    %cst_19 = arith.constant 0.000000e+00 : f32
    %32 = vector.broadcast %cst_19 : f32 to vector<128x128xf32>
    %33 = arith.select %24, %31, %32 : vector<128x128xi1>, vector<128x128xf32>
    %cst_20 = arith.constant dense<0.000000e+00> : vector<128xf32>
    %34 = vector.multi_reduction <add>, %33, %cst_20 [1] : vector<128x128xf32> to vector<128xf32>
    %35 = vector.shape_cast %34 : vector<128xf32> to vector<128x1xf32>
    %36 = math.log %35 : vector<128x1xf32>
    %37 = vector.broadcast %36 : vector<128x1xf32> to vector<128x128xf32>
    %38 = arith.subf %30, %37 : vector<128x128xf32>
    %c0_21 = arith.constant 0 : index
    %c0_22 = arith.constant 0 : index
    %39 = vector.load %arg6[%c0_21, %c0_22] : memref<128x128xf32, #tpu.memory_space<vmem>>, vector<128x128xf32>
    tpu.vector_store %arg6[%c0_21, %c0_22], %38 {strides = array<i32>} : memref<128x128xf32, #tpu.memory_space<vmem>>, vector<128x128xf32>,
    return
  }
  func.func @transform_0(%arg0: i32) -> (i32, i32) {
    %c0_i32 = arith.constant 0 : i32
    %c0_i32_0 = arith.constant 0 : i32
    %c0_i32_1 = arith.constant 0 : i32
    return %c0_i32, %c0_i32_0 : i32, i32
  }
  func.func @transform_1(%arg0: i32) -> (i32, i32) {
    %c0_i32 = arith.constant 0 : i32
    %c0_i32_0 = arith.constant 0 : i32
    %c0_i32_1 = arith.constant 0 : i32
    return %c0_i32, %c0_i32_0 : i32, i32
  }
  func.func @transform_2(%arg0: i32) -> (i32, i32) {
    %c0_i32 = arith.constant 0 : i32
    %c0_i32_0 = arith.constant 0 : i32
    %c0_i32_1 = arith.constant 0 : i32
    return %c0_i32, %c0_i32_0 : i32, i32
  }
  func.func @transform_3(%arg0: i32) -> (i32, i32) {
    %c0_i32 = arith.constant 0 : i32
    %c0_i32_0 = arith.constant 0 : i32
    %c0_i32_1 = arith.constant 0 : i32
    return %c0_i32, %c0_i32_0 : i32, i32
  }
  func.func @transform_4(%arg0: i32) -> (i32, i32) {
    %c0_i32 = arith.constant 0 : i32
    %c0_i32_0 = arith.constant 0 : i32
    %c0_i32_1 = arith.constant 0 : i32
    return %c0_i32, %c0_i32_0 : i32, i32
  }
  func.func @transform_5(%arg0: i32) -> (i32, i32) {
    %c0_i32 = arith.constant 0 : i32
    %c0_i32_0 = arith.constant 0 : i32
    %c0_i32_1 = arith.constant 0 : i32
    return %c0_i32, %c0_i32_0 : i32, i32
  }
}

</mosaic_0001>

<bundles_post_ra>
// kernel: gcn_forward_fused.1
= control target key start
LH: loop header
LB: loop body
LE: loop exit
PB: predicated region body
PF: predicated region fallthrough
CT: control target
= control target key end

     0   :  { %s2051_s2 = inlined_call_operand.vmem [shape: bf16[128,128], index: 2, kind: input, shape index: {}]   ;;  %s2052_s0 = inlined_call_operand.vmem [shape: bf16[128,128], index: 0, kind: input, shape index: {}]   ;;  %s2053_s1 = inlined_call_operand.vmem [shape: bf16[128,128], index: 1, kind: input, shape index: {}]   ;;  %s2054_s3 = inlined_call_operand.vmem [shape: bf16[128,128], index: 3, kind: input, shape index: {}]   ;;  %s2055_s4 = inlined_call_operand.vmem [shape: bf16[128,128], index: 4, kind: input, shape index: {}]   ;;  %s2056_s5 = inlined_call_operand.vmem [shape: f32[128,128], index: 5, kind: output, shape index: {}]  }
   0x1   :  { %v1554_v0 = vld [vmem:[%s2051_s2 + $0x38] sm:$0xff]   ;;  %v1555_v1 = vld [vmem:[%s2051_s2 + $0x30] sm:$0xff]   ;;  %v1556_v2 = vld [vmem:[%s2051_s2 + $0x28] sm:$0xff]  }
   0x2   :  { %1362 = vmatprep.subr.bf16.mxu0 %v1554_v0  ;;  %v1557_v3 = vld [vmem:[%s2051_s2 + $0x20] sm:$0xff]   ;;  %v1558_v5 = vld [vmem:[%s2051_s2 + $0x18] sm:$0xff]   ;;  %v1559_v6 = vld [vmem:[%s2051_s2 + $0x10] sm:$0xff]  }
   0x3   :  { %1363 = vmatpush3.bf16.msra.mxu0 %v1554_v0  ;;  %v1562_v4 = vld [vmem:[%s2052_s0] sm:$0xff]   ;;  %v1560_v7 = vld [vmem:[%s2051_s2 + $0x8] sm:$0xff]   ;;  %v1564_v10 = vld [vmem:[%s2052_s0 + $0x10] sm:$0xff]  }
   0x4   :  { %1364 = vmatprep.subr.bf16.mxu0 %v1555_v1  ;;  %1378 = vmatprep.mubr.bf16.mxu0 %v1562_v4  ;;  %v1561_v8 = vld [vmem:[%s2051_s2] sm:$0xff]   ;;  %v1563_v9 = vld [vmem:[%s2052_s0 + $0x8] sm:$0xff]   ;;  %v1565_v11 = vld [vmem:[%s2052_s0 + $0x18] sm:$0xff]  }
   0x5   :  { %v1566_v12 = vld [vmem:[%s2052_s0 + $0x20] sm:$0xff]   ;;  %v1567_v13 = vld [vmem:[%s2052_s0 + $0x28] sm:$0xff]   ;;  %v1568_v14 = vld [vmem:[%s2052_s0 + $0x30] sm:$0xff]  }
   0x6   :  { %v1569_v15 = vld [vmem:[%s2052_s0 + $0x38] sm:$0xff]   ;;  %v1739_v16 = vld [vmem:[%s2053_s1] sm:$0xff]   ;;  %v1579_v18 = vld [vmem:[%s2054_s3 + $0x30] sm:$0xff]  }
   0x7   :  { %1365 = vmatpush3.bf16.msra.mxu0 %v1555_v1  ;;  %1410 = vmatprep.mubr.bf16.mxu1 %v1739_v16  ;;  %v1578_v17 = vld [vmem:[%s2054_s3 + $0x38] sm:$0xff]   ;;  %v1580_v19 = vld [vmem:[%s2054_s3 + $0x28] sm:$0xff]   ;;  %v1581_v20 = vld [vmem:[%s2054_s3 + $0x20] sm:$0xff]  }
   0x8   :  { %1366 = vmatprep.subr.bf16.mxu0 %v1556_v2  ;;  %v1582_v21 = vld [vmem:[%s2054_s3 + $0x18] sm:$0xff]   ;;  %v1760_v46 = vld [vmem:[%s2053_s1 + $0x8] sm:$0xff]   ;;  %v1765_v47 = vld [vmem:[%s2053_s1 + $0x10] sm:$0xff]  }
   0x9   :  { %v1772_v48 = vld [vmem:[%s2053_s1 + $0x18] sm:$0xff]   ;;  %v1777_v49 = vld [vmem:[%s2053_s1 + $0x20] sm:$0xff]   ;;  %v1784_v50 = vld [vmem:[%s2053_s1 + $0x28] sm:$0xff]  }
   0xa   :  { %v1789_v51 = vld [vmem:[%s2053_s1 + $0x30] sm:$0xff]   ;;  %v1796_v52 = vld [vmem:[%s2053_s1 + $0x38] sm:$0xff]   ;;  %v1584_v54 = vld [vmem:[%s2054_s3 + $0x8] sm:$0xff]  }
   0xb   :  { %1367 = vmatpush3.bf16.msra.mxu0 %v1556_v2  ;;  %v1583_v53 = vld [vmem:[%s2054_s3 + $0x10] sm:$0xff]   ;;  %v1585_v55 = vld [vmem:[%s2054_s3] sm:$0xff]  }
   0xc   :  { %1368 = vmatprep.subr.bf16.mxu0 %v1557_v3 }
   0xf   :  { %1369 = vmatpush3.bf16.msra.mxu0 %v1557_v3 }
  0x10   :  { %1370 = vmatprep.subr.bf16.mxu0 %v1558_v5 }
  0x13   :  { %1371 = vmatpush3.bf16.msra.mxu0 %v1558_v5 }
  0x14   :  { %1372 = vmatprep.subr.bf16.mxu0 %v1559_v6 }
  0x17   :  { %1373 = vmatpush3.bf16.msra.mxu0 %v1559_v6 }
  0x18   :  { %1374 = vmatprep.subr.bf16.mxu0 %v1560_v7 }
  0x1b   :  { %1375 = vmatpush3.bf16.msra.mxu0 %v1560_v7 }
  0x1c   :  { %1376 = vmatprep.subr.bf16.mxu0 %v1561_v8 }
  0x1f   :  { %1377 = vmatpush3.bf16.msra.mxu0 %v1561_v8 }
  0x20   :  { %1426 = vmatprep.subr.bf16.mxu0 %v1578_v17 }
  0x22   :  { %1379 = vmatmul.mubr.bf16.vlgmr.msra.gmra.mxu0 %v1563_v9 }
  0x23   :  { %1382 = vmatprep.mubr.bf16.mxu0 %v1564_v10  ;;  %1427 = vmatpush3.bf16.msra.mxu0 %v1578_v17 }
  0x24   :  { %1428 = vmatprep.subr.bf16.mxu0 %v1579_v18 }
  0x27   :  { %1429 = vmatpush3.bf16.msra.mxu0 %v1579_v18 }
  0x28   :  { %1430 = vmatprep.subr.bf16.mxu0 %v1580_v19 }
  0x2a   :  { %1383 = vmatmul.mubr.bf16.gmra.mxu0 %v1565_v11 }
  0x2b   :  { %1386 = vmatprep.mubr.bf16.mxu0 %v1566_v12  ;;  %1431 = vmatpush3.bf16.msra.mxu0 %v1580_v19 }
  0x2c   :  { %1432 = vmatprep.subr.bf16.mxu0 %v1581_v20 }
  0x2f   :  { %1433 = vmatpush3.bf16.msra.mxu0 %v1581_v20 }
  0x30   :  { %1434 = vmatprep.subr.bf16.mxu0 %v1582_v21 }
  0x32   :  { %1387 = vmatmul.mubr.bf16.gmra.mxu0 %v1567_v13 }
  0x33   :  { %1390 = vmatprep.mubr.bf16.mxu0 %v1568_v14  ;;  %1435 = vmatpush3.bf16.msra.mxu0 %v1582_v21 }
  0x34   :  { %1436 = vmatprep.subr.bf16.mxu0 %v1583_v53 }
  0x37   :  { %1437 = vmatpush3.bf16.msra.mxu0 %v1583_v53 }
  0x38   :  { %1438 = vmatprep.subr.bf16.mxu0 %v1584_v54 }
  0x3a   :  { %1391 = vmatmul.mubr.bf16.gmra.mxu0 %v1569_v15 }
  0x3b   :  { %1439 = vmatpush3.bf16.msra.mxu0 %v1584_v54 }
  0x3c   :  { %1440 = vmatprep.subr.bf16.mxu0 %v1585_v55 }
  0x3f   :  { %1441 = vmatpush3.bf16.msra.mxu0 %v1585_v55 }
  0xe2   :  { %v1380_v22 = vpop.f32.mrf.mxu0 }
  0xe4   :  { %v199_v23 = vpop.f32.mrf.mxu0 }
  0xe6   :  { %v1381_v24 = vpop.f32.mrf.mxu0 }
  0xe7   :  { %v263_v44 = vpack.c.bf16 %v1381_v24, %v1380_v22 }
  0xe8   :  { %v202_v25 = vpop.f32.mrf.mxu0 }
  0xe9   :  { %v262_v45 = vpack.c.bf16 %v202_v25, %v199_v23 }
  0xea   :  { %v1384_v26 = vpop.f32.mrf.mxu0 }
  0xec   :  { %v215_v27 = vpop.f32.mrf.mxu0 }
  0xee   :  { %v1385_v28 = vpop.f32.mrf.mxu0 }
  0xef   :  { %v265_v42 = vpack.c.bf16 %v1385_v28, %v1384_v26 }
  0xf0   :  { %v218_v29 = vpop.f32.mrf.mxu0 }
  0xf1   :  { %v264_v43 = vpack.c.bf16 %v218_v29, %v215_v27 }
  0xf2   :  { %v1388_v30 = vpop.f32.mrf.mxu0 }
  0xf4   :  { %v231_v31 = vpop.f32.mrf.mxu0 }
  0xf6   :  { %v1389_v32 = vpop.f32.mrf.mxu0 }
  0xf7   :  { %v267_v40 = vpack.c.bf16 %v1389_v32, %v1388_v30 }
  0xf8   :  { %v234_v33 = vpop.f32.mrf.mxu0 }
  0xf9   :  { %v266_v41 = vpack.c.bf16 %v234_v33, %v231_v31  ;;  %v1586_v33 = vld [vmem:[%s2055_s4 + $0x38] sm:$0xff]  }
  0xfa   :  { %v1392_v34 = vpop.f32.mrf.mxu0  ;;  %1490 = vmatprep.subr.bf16.mxu0 %v1586_v33 }
  0xfc   :  { %v247_v35 = vpop.f32.mrf.mxu0 }
  0xfe   :  { %v1393_v36 = vpop.f32.mrf.mxu0 }
  0xff   :  { %v269_v37 = vpack.c.bf16 %v1393_v36, %v1392_v34  ;;  %v1587_v34 = vld [vmem:[%s2055_s4 + $0x30] sm:$0xff]   ;;  %v1589_v36 = vld [vmem:[%s2055_s4 + $0x20] sm:$0xff]  }
 0x100   :  { %v250_v38 = vpop.f32.mrf.mxu0 }
 0x101   :  { %v268_v39 = vpack.c.bf16 %v250_v38, %v247_v35  ;;  %1394 = vmatprep.subr.bf16.mxu1 %v269_v37  ;;  %v1588_v35 = vld [vmem:[%s2055_s4 + $0x28] sm:$0xff]  }
 0x102   :  { %1395 = vmatpush3.bf16.msra.mxu1 %v269_v37  ;;  %v1590_v37 = vld [vmem:[%s2055_s4 + $0x18] sm:$0xff]  }
 0x103   :  { %1396 = vmatprep.subr.bf16.mxu1 %v268_v39 }
 0x106   :  { %1397 = vmatpush3.bf16.msra.mxu1 %v268_v39 }
 0x107   :  { %1398 = vmatprep.subr.bf16.mxu1 %v267_v40 }
 0x10a   :  { %1399 = vmatpush3.bf16.msra.mxu1 %v267_v40 }
 0x10b   :  { %1400 = vmatprep.subr.bf16.mxu1 %v266_v41 }
 0x10e   :  { %1401 = vmatpush3.bf16.msra.mxu1 %v266_v41 }
 0x10f   :  { %1402 = vmatprep.subr.bf16.mxu1 %v265_v42 }
 0x112   :  { %1403 = vmatpush3.bf16.msra.mxu1 %v265_v42 }
 0x113   :  { %1404 = vmatprep.subr.bf16.mxu1 %v264_v43 }
 0x116   :  { %1405 = vmatpush3.bf16.msra.mxu1 %v264_v43 }
 0x117   :  { %1406 = vmatprep.subr.bf16.mxu1 %v263_v44 }
 0x11a   :  { %1407 = vmatpush3.bf16.msra.mxu1 %v263_v44 }
 0x11b   :  { %1408 = vmatprep.subr.bf16.mxu1 %v262_v45 }
 0x11e   :  { %1409 = vmatpush3.bf16.msra.mxu1 %v262_v45 }
 0x121   :  { %1411 = vmatmul.mubr.bf16.vlgmr.msra.gmra.mxu1 %v1760_v46 }
 0x122   :  { %1414 = vmatprep.mubr.bf16.mxu1 %v1765_v47 }
 0x129   :  { %1415 = vmatmul.mubr.bf16.gmra.mxu1 %v1772_v48 }
 0x12a   :  { %1418 = vmatprep.mubr.bf16.mxu1 %v1777_v49 }
 0x131   :  { %1419 = vmatmul.mubr.bf16.gmra.mxu1 %v1784_v50 }
 0x132   :  { %1422 = vmatprep.mubr.bf16.mxu1 %v1789_v51 }
 0x139   :  { %1423 = vmatmul.mubr.bf16.gmra.mxu1 %v1796_v52 }
 0x13a   :  { %1474 = vmatprep.mubr.bf16.mxu1 %v1739_v16 }
 0x1e1   :  { %v1412_v56 = vpop.f32.mrf.mxu1 }
 0x1e2   :  { %v417_v63 = vmax.f32 %v1412_v56, 0.0 }
 0x1e3   :  { %v352_v57 = vpop.f32.mrf.mxu1 }
 0x1e4   :  { %v415_v61 = vmax.f32 %v352_v57, 0.0 }
 0x1e5   :  { %v1413_v58 = vpop.f32.mrf.mxu1 }
 0x1e6   :  { %v418_v59 = vmax.f32 %v1413_v58, 0.0 }
 0x1e7   :  { %v355_v60 = vpop.f32.mrf.mxu1 }
 0x1e8   :  { %v416_v62 = vmax.f32 %v355_v60, 0.0  ;;  %v432_v2 = vpack.c.bf16 %v418_v59, %v417_v63 }
 0x1e9   :  { %v1416_v0 = vpop.f32.mrf.mxu1 }
 0x1ea   :  { %v431_v1 = vpack.c.bf16 %v416_v62, %v415_v61  ;;  %v421_v9 = vmax.f32 %v1416_v0, 0.0 }
 0x1eb   :  { %v368_v3 = vpop.f32.mrf.mxu1 }
 0x1ec   :  { %1442 = vmatprep.mubr.bf16.mxu0 %v431_v1  ;;  %v419_v7 = vmax.f32 %v368_v3, 0.0 }
 0x1ed   :  { %v1417_v4 = vpop.f32.mrf.mxu1  ;;  %1443 = vmatmul.mubr.bf16.vlgmr.msra.gmra.mxu0 %v432_v2 }
 0x1ee   :  { %v422_v5 = vmax.f32 %v1417_v4, 0.0  ;;  %1491 = vmatpush3.bf16.msra.mxu0 %v1586_v33 }
 0x1ef   :  { %v371_v6 = vpop.f32.mrf.mxu1  ;;  %1492 = vmatprep.subr.bf16.mxu0 %v1587_v34 }
 0x1f0   :  { %v420_v8 = vmax.f32 %v371_v6, 0.0  ;;  %v434_v12 = vpack.c.bf16 %v422_v5, %v421_v9  ;;  %v1591_v5 = vld [vmem:[%s2055_s4 + $0x10] sm:$0xff]   ;;  %v1592_v6 = vld [vmem:[%s2055_s4 + $0x8] sm:$0xff]  }
 0x1f1   :  { %v1420_v10 = vpop.f32.mrf.mxu1 }
 0x1f2   :  { %v433_v11 = vpack.c.bf16 %v420_v8, %v419_v7  ;;  %v425_v20 = vmax.f32 %v1420_v10, 0.0  ;;  %1493 = vmatpush3.bf16.msra.mxu0 %v1587_v34  ;;  %v1593_v7 = vld [vmem:[%s2055_s4] sm:$0xff]  }
 0x1f3   :  { %v384_v13 = vpop.f32.mrf.mxu1  ;;  %1494 = vmatprep.subr.bf16.mxu0 %v1588_v35 }
 0x1f4   :  { %1446 = vmatprep.mubr.bf16.mxu0 %v433_v11  ;;  %v423_v18 = vmax.f32 %v384_v13, 0.0 }
 0x1f5   :  { %v1421_v14 = vpop.f32.mrf.mxu1  ;;  %1447 = vmatmul.mubr.bf16.gmra.mxu0 %v434_v12 }
 0x1f6   :  { %v426_v15 = vmax.f32 %v1421_v14, 0.0  ;;  %1495 = vmatpush3.bf16.msra.mxu0 %v1588_v35 }
 0x1f7   :  { %v387_v17 = vpop.f32.mrf.mxu1  ;;  %1496 = vmatprep.subr.bf16.mxu0 %v1589_v36 }
 0x1f8   :  { %v424_v19 = vmax.f32 %v387_v17, 0.0  ;;  %v436_v23 = vpack.c.bf16 %v426_v15, %v425_v20 }
 0x1f9   :  { %v1424_v21 = vpop.f32.mrf.mxu1 }
 0x1fa   :  { %v435_v22 = vpack.c.bf16 %v424_v19, %v423_v18  ;;  %v429_v30 = vmax.f32 %v1424_v21, 0.0  ;;  %1497 = vmatpush3.bf16.msra.mxu0 %v1589_v36 }
 0x1fb   :  { %v400_v24 = vpop.f32.mrf.mxu1  ;;  %1498 = vmatprep.subr.bf16.mxu0 %v1590_v37 }
 0x1fc   :  { %1450 = vmatprep.mubr.bf16.mxu0 %v435_v22  ;;  %v427_v28 = vmax.f32 %v400_v24, 0.0 }
 0x1fd   :  { %v1425_v25 = vpop.f32.mrf.mxu1  ;;  %1451 = vmatmul.mubr.bf16.gmra.mxu0 %v436_v23 }
 0x1fe   :  { %v430_v26 = vmax.f32 %v1425_v25, 0.0  ;;  %1499 = vmatpush3.bf16.msra.mxu0 %v1590_v37 }
 0x1ff   :  { %v403_v27 = vpop.f32.mrf.mxu1  ;;  %1500 = vmatprep.subr.bf16.mxu0 %v1591_v5 }
 0x200   :  { %v428_v29 = vmax.f32 %v403_v27, 0.0  ;;  %v438_v32 = vpack.c.bf16 %v430_v26, %v429_v30 }
 0x202   :  { %v437_v31 = vpack.c.bf16 %v428_v29, %v427_v28  ;;  %1501 = vmatpush3.bf16.msra.mxu0 %v1591_v5 }
 0x203   :  { %1502 = vmatprep.subr.bf16.mxu0 %v1592_v6 }
 0x204   :  { %1454 = vmatprep.mubr.bf16.mxu0 %v437_v31 }
 0x205   :  { %1455 = vmatmul.mubr.bf16.gmra.mxu0 %v438_v32 }
 0x206   :  { %1503 = vmatpush3.bf16.msra.mxu0 %v1592_v6 }
 0x207   :  { %1504 = vmatprep.subr.bf16.mxu0 %v1593_v7 }
 0x20a   :  { %1505 = vmatpush3.bf16.msra.mxu0 %v1593_v7 }
 0x2ad   :  { %v1444_v38 = vpop.f32.mrf.mxu0 }
 0x2af   :  { %v537_v39 = vpop.f32.mrf.mxu0 }
 0x2b1   :  { %v1445_v40 = vpop.f32.mrf.mxu0 }
 0x2b2   :  { %v601_v3 = vpack.c.bf16 %v1445_v40, %v1444_v38 }
 0x2b3   :  { %v540_v41 = vpop.f32.mrf.mxu0 }
 0x2b4   :  { %v600_v4 = vpack.c.bf16 %v540_v41, %v537_v39 }
 0x2b5   :  { %v1448_v42 = vpop.f32.mrf.mxu0 }
 0x2b7   :  { %v553_v43 = vpop.f32.mrf.mxu0 }
 0x2b9   :  { %v1449_v44 = vpop.f32.mrf.mxu0 }
 0x2ba   :  { %v603_v1 = vpack.c.bf16 %v1449_v44, %v1448_v42 }
 0x2bb   :  { %v556_v45 = vpop.f32.mrf.mxu0 }
 0x2bc   :  { %v602_v2 = vpack.c.bf16 %v556_v45, %v553_v43 }
 0x2bd   :  { %v1452_v53 = vpop.f32.mrf.mxu0 }
 0x2bf   :  { %v569_v54 = vpop.f32.mrf.mxu0 }
 0x2c1   :  { %v1453_v55 = vpop.f32.mrf.mxu0 }
 0x2c2   :  { %v605_v63 = vpack.c.bf16 %v1453_v55, %v1452_v53 }
 0x2c3   :  { %v572_v56 = vpop.f32.mrf.mxu0 }
 0x2c4   :  { %v604_v0 = vpack.c.bf16 %v572_v56, %v569_v54 }
 0x2c5   :  { %v1456_v57 = vpop.f32.mrf.mxu0 }
 0x2c7   :  { %v585_v58 = vpop.f32.mrf.mxu0 }
 0x2c9   :  { %v1457_v59 = vpop.f32.mrf.mxu0 }
 0x2ca   :  { %v607_v60 = vpack.c.bf16 %v1457_v59, %v1456_v57 }
 0x2cb   :  { %v588_v61 = vpop.f32.mrf.mxu0 }
 0x2cc   :  { %v606_v62 = vpack.c.bf16 %v588_v61, %v585_v58  ;;  %1458 = vmatprep.subr.bf16.mxu1 %v607_v60 }
 0x2cd   :  { %1459 = vmatpush3.bf16.msra.mxu1 %v607_v60 }
 0x2ce   :  { %1460 = vmatprep.subr.bf16.mxu1 %v606_v62 }
 0x2d1   :  { %1461 = vmatpush3.bf16.msra.mxu1 %v606_v62 }
 0x2d2   :  { %1462 = vmatprep.subr.bf16.mxu1 %v605_v63 }
 0x2d5   :  { %1463 = vmatpush3.bf16.msra.mxu1 %v605_v63 }
 0x2d6   :  { %1464 = vmatprep.subr.bf16.mxu1 %v604_v0 }
 0x2d9   :  { %1465 = vmatpush3.bf16.msra.mxu1 %v604_v0 }
 0x2da   :  { %1466 = vmatprep.subr.bf16.mxu1 %v603_v1 }
 0x2dd   :  { %1467 = vmatpush3.bf16.msra.mxu1 %v603_v1 }
 0x2de   :  { %1468 = vmatprep.subr.bf16.mxu1 %v602_v2 }
 0x2e1   :  { %1469 = vmatpush3.bf16.msra.mxu1 %v602_v2 }
 0x2e2   :  { %1470 = vmatprep.subr.bf16.mxu1 %v601_v3 }
 0x2e5   :  { %1471 = vmatpush3.bf16.msra.mxu1 %v601_v3 }
 0x2e6   :  { %1472 = vmatprep.subr.bf16.mxu1 %v600_v4 }
 0x2e9   :  { %1473 = vmatpush3.bf16.msra.mxu1 %v600_v4 }
 0x2ec   :  { %1475 = vmatmul.mubr.bf16.vlgmr.msra.gmra.mxu1 %v1760_v46 }
 0x2ed   :  { %1478 = vmatprep.mubr.bf16.mxu1 %v1765_v47 }
 0x2f4   :  { %1479 = vmatmul.mubr.bf16.gmra.mxu1 %v1772_v48 }
 0x2f5   :  { %1482 = vmatprep.mubr.bf16.mxu1 %v1777_v49 }
 0x2fc   :  { %1483 = vmatmul.mubr.bf16.gmra.mxu1 %v1784_v50 }
 0x2fd   :  { %1486 = vmatprep.mubr.bf16.mxu1 %v1789_v51 }
 0x304   :  { %1487 = vmatmul.mubr.bf16.gmra.mxu1 %v1796_v52 }
 0x305   :  { %1538 = vmatprep.mubr.bf16.mxu1 %v1739_v16 }
 0x3ac   :  { %v1476_v8 = vpop.f32.mrf.mxu1 }
 0x3ad   :  { %v707_v14 = vmax.f32 %v1476_v8, 0.0 }
 0x3ae   :  { %v642_v16 = vpop.f32.mrf.mxu1 }
 0x3af   :  { %v705_v12 = vmax.f32 %v642_v16, 0.0 }
 0x3b0   :  { %v1477_v9 = vpop.f32.mrf.mxu1 }
 0x3b1   :  { %v708_v10 = vmax.f32 %v1477_v9, 0.0 }
 0x3b2   :  { %v645_v11 = vpop.f32.mrf.mxu1 }
 0x3b3   :  { %v706_v13 = vmax.f32 %v645_v11, 0.0  ;;  %v722_v18 = vpack.c.bf16 %v708_v10, %v707_v14  ;;  %v1011_v14 = vlaneseq }
 0x3b4   :  { %v1480_v15 = vpop.f32.mrf.mxu1 }
 0x3b5   :  { %v721_v17 = vpack.c.bf16 %v706_v13, %v705_v12  ;;  %v711_v25 = vmax.f32 %v1480_v15, 0.0  ;;  %v1848_v15 = vand.u32 127, %v1011_v14 }
 0x3b6   :  { %v658_v19 = vpop.f32.mrf.mxu1 }
 0x3b7   :  { %1506 = vmatprep.mubr.bf16.mxu0 %v721_v17  ;;  %v709_v23 = vmax.f32 %v658_v19, 0.0  ;;  %vm1013_vm0 = vcmp.lt.s32.totalorder %v1848_v15, 8 }
 0x3b8   :  { %v1481_v20 = vpop.f32.mrf.mxu1  ;;  %1507 = vmatmul.mubr.bf16.vlgmr.msra.gmra.mxu0 %v722_v18 }
 0x3b9   :  { %v712_v21 = vmax.f32 %v1481_v20, 0.0 }
 0x3ba   :  { %v661_v22 = vpop.f32.mrf.mxu1 }
 0x3bb   :  { %v710_v24 = vmax.f32 %v661_v22, 0.0  ;;  %v724_v28 = vpack.c.bf16 %v712_v21, %v711_v25 }
 0x3bc   :  { %v1484_v26 = vpop.f32.mrf.mxu1 }
 0x3bd   :  { %v723_v27 = vpack.c.bf16 %v710_v24, %v709_v23  ;;  %v715_v35 = vmax.f32 %v1484_v26, 0.0 }
 0x3be   :  { %v674_v29 = vpop.f32.mrf.mxu1 }
 0x3bf   :  { %1510 = vmatprep.mubr.bf16.mxu0 %v723_v27  ;;  %v713_v33 = vmax.f32 %v674_v29, 0.0 }
 0x3c0   :  { %v1485_v30 = vpop.f32.mrf.mxu1  ;;  %1511 = vmatmul.mubr.bf16.gmra.mxu0 %v724_v28 }
 0x3c1   :  { %v716_v31 = vmax.f32 %v1485_v30, 0.0 }
 0x3c2   :  { %v677_v32 = vpop.f32.mrf.mxu1 }
 0x3c3   :  { %v714_v34 = vmax.f32 %v677_v32, 0.0  ;;  %v726_v38 = vpack.c.bf16 %v716_v31, %v715_v35 }
 0x3c4   :  { %v1488_v36 = vpop.f32.mrf.mxu1 }
 0x3c5   :  { %v725_v37 = vpack.c.bf16 %v714_v34, %v713_v33  ;;  %v719_v45 = vmax.f32 %v1488_v36, 0.0 }
 0x3c6   :  { %v690_v39 = vpop.f32.mrf.mxu1 }
 0x3c7   :  { %1514 = vmatprep.mubr.bf16.mxu0 %v725_v37  ;;  %v717_v43 = vmax.f32 %v690_v39, 0.0 }
 0x3c8   :  { %v1489_v40 = vpop.f32.mrf.mxu1  ;;  %1515 = vmatmul.mubr.bf16.gmra.mxu0 %v726_v38 }
 0x3c9   :  { %v720_v41 = vmax.f32 %v1489_v40, 0.0 }
 0x3ca   :  { %v693_v42 = vpop.f32.mrf.mxu1 }
 0x3cb   :  { %v718_v44 = vmax.f32 %v693_v42, 0.0  ;;  %v728_v54 = vpack.c.bf16 %v720_v41, %v719_v45 }
 0x3cd   :  { %v727_v53 = vpack.c.bf16 %v718_v44, %v717_v43 }
 0x3cf   :  { %1518 = vmatprep.mubr.bf16.mxu0 %v727_v53 }
 0x3d0   :  { %1519 = vmatmul.mubr.bf16.gmra.mxu0 %v728_v54 }
 0x478   :  { %v1508_v55 = vpop.f32.mrf.mxu0 }
 0x47a   :  { %v827_v56 = vpop.f32.mrf.mxu0 }
 0x47c   :  { %v1509_v57 = vpop.f32.mrf.mxu0 }
 0x47d   :  { %v891_v12 = vpack.c.bf16 %v1509_v57, %v1508_v55 }
 0x47e   :  { %v830_v58 = vpop.f32.mrf.mxu0 }
 0x47f   :  { %v890_v13 = vpack.c.bf16 %v830_v58, %v827_v56 }
 0x480   :  { %v1512_v59 = vpop.f32.mrf.mxu0 }
 0x482   :  { %v843_v60 = vpop.f32.mrf.mxu0 }
 0x484   :  { %v1513_v61 = vpop.f32.mrf.mxu0 }
 0x485   :  { %v893_v10 = vpack.c.bf16 %v1513_v61, %v1512_v59 }
 0x486   :  { %v846_v62 = vpop.f32.mrf.mxu0 }
 0x487   :  { %v892_v11 = vpack.c.bf16 %v846_v62, %v843_v60 }
 0x488   :  { %v1516_v63 = vpop.f32.mrf.mxu0 }
 0x48a   :  { %v859_v0 = vpop.f32.mrf.mxu0 }
 0x48c   :  { %v1517_v1 = vpop.f32.mrf.mxu0 }
 0x48d   :  { %v895_v16 = vpack.c.bf16 %v1517_v1, %v1516_v63 }
 0x48e   :  { %v862_v2 = vpop.f32.mrf.mxu0 }
 0x48f   :  { %v894_v9 = vpack.c.bf16 %v862_v2, %v859_v0 }
 0x490   :  { %v1520_v3 = vpop.f32.mrf.mxu0 }
 0x492   :  { %v875_v4 = vpop.f32.mrf.mxu0 }
 0x494   :  { %v1521_v5 = vpop.f32.mrf.mxu0 }
 0x495   :  { %v897_v6 = vpack.c.bf16 %v1521_v5, %v1520_v3 }
 0x496   :  { %v878_v7 = vpop.f32.mrf.mxu0 }
 0x497   :  { %v896_v8 = vpack.c.bf16 %v878_v7, %v875_v4  ;;  %1522 = vmatprep.subr.bf16.mxu1 %v897_v6 }
 0x498   :  { %1523 = vmatpush3.bf16.msra.mxu1 %v897_v6 }
 0x499   :  { %1524 = vmatprep.subr.bf16.mxu1 %v896_v8 }
 0x49c   :  { %1525 = vmatpush3.bf16.msra.mxu1 %v896_v8 }
 0x49d   :  { %1526 = vmatprep.subr.bf16.mxu1 %v895_v16 }
 0x4a0   :  { %1527 = vmatpush3.bf16.msra.mxu1 %v895_v16 }
 0x4a1   :  { %1528 = vmatprep.subr.bf16.mxu1 %v894_v9 }
 0x4a4   :  { %1529 = vmatpush3.bf16.msra.mxu1 %v894_v9 }
 0x4a5   :  { %1530 = vmatprep.subr.bf16.mxu1 %v893_v10 }
 0x4a8   :  { %1531 = vmatpush3.bf16.msra.mxu1 %v893_v10 }
 0x4a9   :  { %1532 = vmatprep.subr.bf16.mxu1 %v892_v11 }
 0x4ac   :  { %1533 = vmatpush3.bf16.msra.mxu1 %v892_v11 }
 0x4ad   :  { %1534 = vmatprep.subr.bf16.mxu1 %v891_v12 }
 0x4b0   :  { %1535 = vmatpush3.bf16.msra.mxu1 %v891_v12 }
 0x4b1   :  { %1536 = vmatprep.subr.bf16.mxu1 %v890_v13 }
 0x4b4   :  { %1537 = vmatpush3.bf16.msra.mxu1 %v890_v13 }
 0x4b7   :  { %1539 = vmatmul.mubr.bf16.vlgmr.msra.gmra.mxu1 %v1760_v46 }
 0x4b8   :  { %1542 = vmatprep.mubr.bf16.mxu1 %v1765_v47 }
 0x4bf   :  { %1543 = vmatmul.mubr.bf16.gmra.mxu1 %v1772_v48 }
 0x4c0   :  { %1546 = vmatprep.mubr.bf16.mxu1 %v1777_v49 }
 0x4c7   :  { %1547 = vmatmul.mubr.bf16.gmra.mxu1 %v1784_v50 }
 0x4c8   :  { %1550 = vmatprep.mubr.bf16.mxu1 %v1789_v51 }
 0x4cf   :  { %1551 = vmatmul.mubr.bf16.gmra.mxu1 %v1796_v52 }
 0x577   :  { %v1540_v17 = vpop.f32.mrf.mxu1 }
 0x578   :  { %v997_v18 = vmax.f32 %v1540_v17, 0.0 }
 0x579   :  { %v932_v46 = vpop.f32.mrf.mxu1 }
 0x57a   :  { %v995_v19 = vmax.f32 %v932_v46, 0.0  ;;  %v1016_v47 = vsel %vm1013_vm0, %v997_v18, -1e+30 }
 0x57b   :  { %1034 = vmax.xlane.f32.xlu1 %v1016_v47  ;;  %v1541_v48 = vpop.f32.mrf.mxu1 }
 0x57c   :  { %v998_v49 = vmax.f32 %v1541_v48, 0.0  ;;  %v1014_v50 = vsel %vm1013_vm0, %v995_v19, -1e+30 }
 0x57d   :  { %1030 = vmax.xlane.f32.xlu0 %v1014_v50  ;;  %v935_v51 = vpop.f32.mrf.mxu1 }
 0x57e   :  { %v996_v52 = vmax.f32 %v935_v51, 0.0  ;;  %v1017_v20 = vsel %vm1013_vm0, %v998_v49, -1e+30 }
 0x57f   :  { %1036 = vmax.xlane.f32.xlu1 %v1017_v20  ;;  %v1544_v21 = vpop.f32.mrf.mxu1 }
 0x580   :  { %v1001_v22 = vmax.f32 %v1544_v21, 0.0  ;;  %v1015_v23 = vsel %vm1013_vm0, %v996_v52, -1e+30 }
 0x581   :  { %1032 = vmax.xlane.f32.xlu0 %v1015_v23  ;;  %v948_v24 = vpop.f32.mrf.mxu1 }
 0x582   :  { %v999_v26 = vmax.f32 %v948_v24, 0.0  ;;  %v1020_v28 = vsel %vm1013_vm0, %v1001_v22, -1e+30 }
 0x583   :  { %v1545_v25 = vpop.f32.mrf.mxu1 }
 0x584   :  { %v1002_v27 = vmax.f32 %v1545_v25, 0.0  ;;  %v1018_v34 = vsel %vm1013_vm0, %v999_v26, -1e+30 }
 0x585   :  { %1042 = vmax.xlane.f32.xlu0 %v1020_v28  ;;  %v951_v29 = vpop.f32.mrf.mxu1 }
 0x586   :  { %v1000_v30 = vmax.f32 %v951_v29, 0.0  ;;  %v1021_v31 = vsel %vm1013_vm0, %v1002_v27, -1e+30 }
 0x587   :  { %1044 = vmax.xlane.f32.xlu1 %v1021_v31  ;;  %v1548_v32 = vpop.f32.mrf.mxu1 }
 0x588   :  { %v1005_v33 = vmax.f32 %v1548_v32, 0.0  ;;  %v1019_v36 = vsel %vm1013_vm0, %v1000_v30, -1e+30 }
 0x589   :  { %1038 = vmax.xlane.f32.xlu0 %v1018_v34  ;;  %v964_v35 = vpop.f32.mrf.mxu1 }
 0x58a   :  { %v1003_v38 = vmax.f32 %v964_v35, 0.0  ;;  %v1024_v40 = vsel %vm1013_vm0, %v1005_v33, -1e+30 }
 0x58b   :  { %1040 = vmax.xlane.f32.xlu1 %v1019_v36  ;;  %v1549_v37 = vpop.f32.mrf.mxu1 }
 0x58c   :  { %v1006_v39 = vmax.f32 %v1549_v37, 0.0  ;;  %v1873_v45 = vsel %vm1013_vm0, %v1003_v38, -1e+30 }
 0x58d   :  { %1050 = vmax.xlane.f32.xlu0 %v1024_v40  ;;  %v967_v41 = vpop.f32.mrf.mxu1 }
 0x58e   :  { %v1004_v42 = vmax.f32 %v967_v41, 0.0  ;;  %v1025_v43 = vsel %vm1013_vm0, %v1006_v39, -1e+30 }
 0x58f   :  { %1052 = vmax.xlane.f32.xlu1 %v1025_v43  ;;  %v1552_v44 = vpop.f32.mrf.mxu1 }
 0x590   :  { %v1878_v55 = vsel %vm1013_vm0, %v1004_v42, -1e+30  ;;  %v1009_v57 = vmax.f32 %v1552_v44, 0.0 }
 0x591   :  { %1046 = vmax.xlane.f32.xlu0 %v1873_v45  ;;  %v980_v53 = vpop.f32.mrf.mxu1 }
 0x592   :  { %v1007_v54 = vmax.f32 %v980_v53, 0.0  ;;  %v1888_v62 = vsel %vm1013_vm0, %v1009_v57, -1e+30 }
 0x593   :  { %1048 = vmax.xlane.f32.xlu1 %v1878_v55  ;;  %v1553_v56 = vpop.f32.mrf.mxu1 }
 0x594   :  { %v1883_v58 = vsel %vm1013_vm0, %v1007_v54, -1e+30  ;;  %v1010_v61 = vmax.f32 %v1553_v56, 0.0 }
 0x595   :  { %1054 = vmax.xlane.f32.xlu0 %v1883_v58  ;;  %v983_v59 = vpop.f32.mrf.mxu1 }
 0x596   :  { %v1008_v60 = vmax.f32 %v983_v59, 0.0  ;;  %v1898_v0 = vsel %vm1013_vm0, %v1010_v61, -1e+30 }
 0x598   :  { %v1892_v63 = vsel %vm1013_vm0, %v1008_v60, -1e+30 }
 0x599   :  { %1058 = vmax.xlane.f32.xlu0 %v1888_v62  ;;  %1056 = vmax.xlane.f32.xlu1 %v1892_v63 }
 0x59d   :  { %1060 = vmax.xlane.f32.xlu1 %v1898_v0 }
 0x604   :  { %v1035_v1 = vpop.xlane.xlu1 %1034 }
 0x605   :  { %v1901_v2 = vsub.f32 %v1016_v47, %v1035_v1 }
 0x606   :  { %v1031_v3 = vpop.xlane.xlu0 %1030 }
 0x607   :  { %v1082_v4 = vmul.f32 1.442695, %v1901_v2  ;;  %v1904_v5 = vsub.f32 %v1014_v50, %v1031_v3 }
 0x608   :  { %v1037_v6 = vpop.xlane.xlu1 %1036 }
 0x609   :  { %1594 = vpow2.f32 %v1082_v4  ;;  %v1078_v7 = vmul.f32 1.442695, %v1904_v5  ;;  %v1907_v8 = vsub.f32 %v1017_v20, %v1037_v6 }
 0x60a   :  { %v1033_v16 = vpop.xlane.xlu0 %1032 }
 0x60b   :  { %1596 = vpow2.f32 %v1078_v7  ;;  %v1084_v9 = vmul.f32 1.442695, %v1907_v8  ;;  %v1910_v10 = vsub.f32 %v1015_v23, %v1033_v16 }
 0x60d   :  { %1598 = vpow2.f32 %v1084_v9  ;;  %v1080_v11 = vmul.f32 1.442695, %v1910_v10 }
 0x60e   :  { %v1043_v12 = vpop.xlane.xlu0 %1042 }
 0x60f   :  { %1600 = vpow2.f32 %v1080_v11  ;;  %v1913_v13 = vsub.f32 %v1020_v28, %v1043_v12 }
 0x610   :  { %v1045_v14 = vpop.xlane.xlu1 %1044 }
 0x611   :  { %v1090_v17 = vmul.f32 1.442695, %v1913_v13  ;;  %v1916_v18 = vsub.f32 %v1021_v31, %v1045_v14 }
 0x612   :  { %v1039_v46 = vpop.xlane.xlu0 %1038 }
 0x613   :  { %1602 = vpow2.f32 %v1090_v17  ;;  %v1092_v19 = vmul.f32 1.442695, %v1916_v18  ;;  %v1919_v47 = vsub.f32 %v1018_v34, %v1039_v46 }
 0x614   :  { %v1041_v48 = vpop.xlane.xlu1 %1040 }
 0x615   :  { %1604 = vpow2.f32 %v1092_v19  ;;  %v1086_v49 = vmul.f32 1.442695, %v1919_v47  ;;  %v1922_v50 = vsub.f32 %v1019_v36, %v1041_v48 }
 0x616   :  { %v1595_v51 = vpop.eup %1594  ;;  %v1051_v52 = vpop.xlane.xlu0 %1050 }
 0x617   :  { %1606 = vpow2.f32 %v1086_v49  ;;  %v1088_v20 = vmul.f32 1.442695, %v1922_v50  ;;  %v1925_v21 = vsub.f32 %v1024_v40, %v1051_v52  ;;  %v1112_v22 = vsel %vm1013_vm0, %v1595_v51, 0.0 }
 0x618   :  { %v1597_v23 = vpop.eup %1596  ;;  %v1053_v24 = vpop.xlane.xlu1 %1052  ;;  %1130 = vadd.xlane.f32.xlu0 %v1112_v22 }
 0x619   :  { %1608 = vpow2.f32 %v1088_v20  ;;  %v1098_v25 = vmul.f32 1.442695, %v1925_v21  ;;  %v1930_v26 = vsub.f32 %v1025_v43, %v1053_v24  ;;  %v1110_v29 = vsel %vm1013_vm0, %v1597_v23, 0.0 }
 0x61a   :  { %v1599_v27 = vpop.eup %1598  ;;  %v1047_v28 = vpop.xlane.xlu0 %1046 }
 0x61b   :  { %1610 = vpow2.f32 %v1098_v25  ;;  %v1100_v30 = vmul.f32 1.442695, %v1930_v26  ;;  %v1936_v31 = vsub.f32 %v1873_v45, %v1047_v28  ;;  %v1113_v32 = vsel %vm1013_vm0, %v1599_v27, 0.0 }
 0x61c   :  { %v1601_v33 = vpop.eup %1600  ;;  %v1049_v34 = vpop.xlane.xlu1 %1048  ;;  %1126 = vadd.xlane.f32.xlu0 %v1110_v29  ;;  %1132 = vadd.xlane.f32.xlu1 %v1113_v32 }
 0x61d   :  { %1612 = vpow2.f32 %v1100_v30  ;;  %v1094_v35 = vmul.f32 1.442695, %v1936_v31  ;;  %v1942_v36 = vsub.f32 %v1878_v55, %v1049_v34  ;;  %v1111_v40 = vsel %vm1013_vm0, %v1601_v33, 0.0 }
 0x61e   :  { %v1055_v37 = vpop.xlane.xlu0 %1054 }
 0x61f   :  { %1614 = vpow2.f32 %v1094_v35  ;;  %v1096_v38 = vmul.f32 1.442695, %v1942_v36  ;;  %v1946_v39 = vsub.f32 %v1883_v58, %v1055_v37 }
 0x620   :  { %v1603_v41 = vpop.eup %1602  ;;  %1128 = vadd.xlane.f32.xlu1 %v1111_v40 }
 0x621   :  { %1616 = vpow2.f32 %v1096_v38  ;;  %v1102_v42 = vmul.f32 1.442695, %v1946_v39  ;;  %v1116_v43 = vsel %vm1013_vm0, %v1603_v41, 0.0 }
 0x622   :  { %v1605_v44 = vpop.eup %1604  ;;  %1138 = vadd.xlane.f32.xlu0 %v1116_v43  ;;  %v1059_v45 = vpop.xlane.xlu0 %1058 }
 0x623   :  { %v1057_v53 = vpop.xlane.xlu1 %1056  ;;  %1618 = vpow2.f32 %v1102_v42  ;;  %v1954_v54 = vsub.f32 %v1888_v62, %v1059_v45  ;;  %v1117_v56 = vsel %vm1013_vm0, %v1605_v44, 0.0 }
 0x624   :  { %v1957_v55 = vsub.f32 %v1892_v63, %v1057_v53  ;;  %v1607_v57 = vpop.eup %1606  ;;  %1140 = vadd.xlane.f32.xlu1 %v1117_v56 }
 0x625   :  { %v1106_v58 = vmul.f32 1.442695, %v1954_v54  ;;  %v1114_v60 = vsel %vm1013_vm0, %v1607_v57, 0.0 }
 0x626   :  { %v1104_v59 = vmul.f32 1.442695, %v1957_v55  ;;  %v1609_v61 = vpop.eup %1608  ;;  %1134 = vadd.xlane.f32.xlu0 %v1114_v60 }
 0x627   :  { %v1061_v1 = vpop.xlane.xlu1 %1060  ;;  %1620 = vpow2.f32 %v1106_v58  ;;  %v1115_v63 = vsel %vm1013_vm0, %v1609_v61, 0.0 }
 0x628   :  { %v1966_v62 = vsub.f32 %v1898_v0, %v1061_v1  ;;  %v1611_v3 = vpop.eup %1610  ;;  %1622 = vpow2.f32 %v1104_v59  ;;  %1136 = vadd.xlane.f32.xlu1 %v1115_v63 }
 0x629   :  { %v1120_v6 = vsel %vm1013_vm0, %v1611_v3, 0.0 }
 0x62a   :  { %v1108_v4 = vmul.f32 1.442695, %v1966_v62  ;;  %v1613_v7 = vpop.eup %1612  ;;  %1146 = vadd.xlane.f32.xlu0 %v1120_v6 }
 0x62b   :  { %v1121_v16 = vsel %vm1013_vm0, %v1613_v7, 0.0 }
 0x62c   :  { %1624 = vpow2.f32 %v1108_v4  ;;  %v1615_v9 = vpop.eup %1614  ;;  %1148 = vadd.xlane.f32.xlu1 %v1121_v16 }
 0x62d   :  { %v1118_v0 = vsel %vm1013_vm0, %v1615_v9, 0.0 }
 0x62e   :  { %v1617_v11 = vpop.eup %1616  ;;  %1142 = vadd.xlane.f32.xlu0 %v1118_v0 }
 0x62f   :  { %v1119_v12 = vsel %vm1013_vm0, %v1617_v11, 0.0 }
 0x630   :  { %v1619_v14 = vpop.eup %1618  ;;  %1144 = vadd.xlane.f32.xlu1 %v1119_v12 }
 0x631   :  { %v1122_v17 = vsel %vm1013_vm0, %v1619_v14, 0.0 }
 0x632   :  { %1150 = vadd.xlane.f32.xlu0 %v1122_v17 }
 0x634   :  { %v1621_v46 = vpop.eup %1620 }
 0x635   :  { %v1623_v19 = vpop.eup %1622  ;;  %v1124_v48 = vsel %vm1013_vm0, %v1621_v46, 0.0 }
 0x636   :  { %1154 = vadd.xlane.f32.xlu0 %v1124_v48  ;;  %v1123_v49 = vsel %vm1013_vm0, %v1623_v19, 0.0 }
 0x637   :  { %1152 = vadd.xlane.f32.xlu1 %v1123_v49 }
 0x639   :  { %v1625_v51 = vpop.eup %1624 }
 0x63a   :  { %v1125_v52 = vsel %vm1013_vm0, %v1625_v51, 0.0 }
 0x63b   :  { %1156 = vadd.xlane.f32.xlu1 %v1125_v52 }
 0x6a1   :  { %v1131_v20 = vpop.xlane.xlu0 %1130 }
 0x6a2   :  { %1626 = vlog2.f32 %v1131_v20 }
 0x6a5   :  { %v1127_v22 = vpop.xlane.xlu0 %1126  ;;  %v1133_v23 = vpop.xlane.xlu1 %1132 }
 0x6a6   :  { %1628 = vlog2.f32 %v1127_v22 }
 0x6a7   :  { %1630 = vlog2.f32 %v1133_v23 }
 0x6a9   :  { %v1129_v24 = vpop.xlane.xlu1 %1128 }
 0x6aa   :  { %1632 = vlog2.f32 %v1129_v24 }
 0x6ab   :  { %v1139_v25 = vpop.xlane.xlu0 %1138 }
 0x6ac   :  { %1634 = vlog2.f32 %v1139_v25 }
 0x6ad   :  { %v1141_v27 = vpop.xlane.xlu1 %1140 }
 0x6ae   :  { %1636 = vlog2.f32 %v1141_v27 }
 0x6af   :  { %v1627_v28 = vpop.eup %1626  ;;  %v1135_v29 = vpop.xlane.xlu0 %1134 }
 0x6b0   :  { %v1163_v30 = vmul.f32 0.6931472, %v1627_v28  ;;  %1638 = vlog2.f32 %v1135_v29 }
 0x6b1   :  { %v1137_v32 = vpop.xlane.xlu1 %1136 }
 0x6b2   :  { %v1192_v15 = vsub.f32 %v1901_v2, %v1163_v30  ;;  %1640 = vlog2.f32 %v1137_v32 }
 0x6b3   :  { %v1629_v33 = vpop.eup %1628  ;;  %v1147_v34 = vpop.xlane.xlu0 %1146 }
 0x6b4   :  { %v1631_v35 = vpop.eup %1630  ;;  %1208 = vst [vmem:[%s2056_s5 + $0x10] sm:$0xff] %v1192_v15  ;;  %v1159_v37 = vmul.f32 0.6931472, %v1629_v33  ;;  %1642 = vlog2.f32 %v1147_v34 }
 0x6b5   :  { %v1165_v38 = vmul.f32 0.6931472, %v1631_v35  ;;  %v1149_v40 = vpop.xlane.xlu1 %1148 }
 0x6b6   :  { %v1190_v41 = vsub.f32 %v1904_v5, %v1159_v37  ;;  %1644 = vlog2.f32 %v1149_v40 }
 0x6b7   :  { %v1633_v42 = vpop.eup %1632  ;;  %v1193_v43 = vsub.f32 %v1907_v8, %v1165_v38  ;;  %v1143_v44 = vpop.xlane.xlu0 %1142 }
 0x6b8   :  { %1206 = vst [vmem:[%s2056_s5] sm:$0xff] %v1190_v41  ;;  %v1161_v2 = vmul.f32 0.6931472, %v1633_v42  ;;  %1646 = vlog2.f32 %v1143_v44 }
 0x6b9   :  { %v1635_v45 = vpop.eup %1634  ;;  %1209 = vst [vmem:[%s2056_s5 + $0x18] sm:$0xff] %v1193_v43  ;;  %v1145_v53 = vpop.xlane.xlu1 %1144 }
 0x6ba   :  { %v1191_v56 = vsub.f32 %v1910_v10, %v1161_v2  ;;  %v1171_v5 = vmul.f32 0.6931472, %v1635_v45  ;;  %1648 = vlog2.f32 %v1145_v53 }
 0x6bb   :  { %v1637_v57 = vpop.eup %1636  ;;  %v1151_v58 = vpop.xlane.xlu0 %1150 }
 0x6bc   :  { %1207 = vst [vmem:[%s2056_s5 + $0x8] sm:$0xff] %v1191_v56  ;;  %v1196_v8 = vsub.f32 %v1913_v13, %v1171_v5  ;;  %v1173_v59 = vmul.f32 0.6931472, %v1637_v57  ;;  %1650 = vlog2.f32 %v1151_v58 }
 0x6bd   :  { %v1639_v60 = vpop.eup %1638 }
 0x6be   :  { %1212 = vst [vmem:[%s2056_s5 + $0x30] sm:$0xff] %v1196_v8  ;;  %v1197_v61 = vsub.f32 %v1916_v18, %v1173_v59  ;;  %v1167_v10 = vmul.f32 0.6931472, %v1639_v60 }
 0x6bf   :  { %v1641_v1 = vpop.eup %1640  ;;  %v1155_v63 = vpop.xlane.xlu0 %1154 }
 0x6c0   :  { %1213 = vst [vmem:[%s2056_s5 + $0x38] sm:$0xff] %v1197_v61  ;;  %v1194_v3 = vsub.f32 %v1919_v47, %v1167_v10  ;;  %v1169_v4 = vmul.f32 0.6931472, %v1641_v1  ;;  %1652 = vlog2.f32 %v1155_v63  ;;  %v1153_v13 = vpop.xlane.xlu1 %1152 }
 0x6c1   :  { %v1643_v6 = vpop.eup %1642  ;;  %1654 = vlog2.f32 %v1153_v13 }
 0x6c2   :  { %1210 = vst [vmem:[%s2056_s5 + $0x20] sm:$0xff] %v1194_v3  ;;  %v1195_v18 = vsub.f32 %v1922_v50, %v1169_v4  ;;  %v1179_v7 = vmul.f32 0.6931472, %v1643_v6 }
 0x6c3   :  { %v1645_v16 = vpop.eup %1644 }
 0x6c4   :  { %1211 = vst [vmem:[%s2056_s5 + $0x28] sm:$0xff] %v1195_v18  ;;  %v1200_v9 = vsub.f32 %v1925_v21, %v1179_v7  ;;  %v1181_v47 = vmul.f32 0.6931472, %v1645_v16  ;;  %v1157_v0 = vpop.xlane.xlu1 %1156 }
 0x6c5   :  { %v1647_v11 = vpop.eup %1646  ;;  %1656 = vlog2.f32 %v1157_v0 }
 0x6c6   :  { %1216 = vst [vmem:[%s2056_s5 + $0x50] sm:$0xff] %v1200_v9  ;;  %v1201_v12 = vsub.f32 %v1930_v26, %v1181_v47  ;;  %v1175_v14 = vmul.f32 0.6931472, %v1647_v11 }
 0x6c7   :  { %v1649_v50 = vpop.eup %1648 }
 0x6c8   :  { %1217 = vst [vmem:[%s2056_s5 + $0x58] sm:$0xff] %v1201_v12  ;;  %v1198_v17 = vsub.f32 %v1936_v31, %v1175_v14  ;;  %v1177_v46 = vmul.f32 0.6931472, %v1649_v50 }
 0x6c9   :  { %v1651_v21 = vpop.eup %1650 }
 0x6ca   :  { %1214 = vst [vmem:[%s2056_s5 + $0x40] sm:$0xff] %v1198_v17  ;;  %v1199_v19 = vsub.f32 %v1942_v36, %v1177_v46  ;;  %v1183_v48 = vmul.f32 0.6931472, %v1651_v21 }
 0x6cc   :  { %1215 = vst [vmem:[%s2056_s5 + $0x48] sm:$0xff] %v1199_v19  ;;  %v1202_v26 = vsub.f32 %v1946_v39, %v1183_v48 }
 0x6cd   :  { %v1653_v49 = vpop.eup %1652 }
 0x6ce   :  { %v1655_v51 = vpop.eup %1654  ;;  %1218 = vst [vmem:[%s2056_s5 + $0x60] sm:$0xff] %v1202_v26  ;;  %v1187_v31 = vmul.f32 0.6931472, %v1653_v49 }
 0x6cf   :  { %v1185_v52 = vmul.f32 0.6931472, %v1655_v51 }
 0x6d0   :  { %v1204_v20 = vsub.f32 %v1954_v54, %v1187_v31 }
 0x6d1   :  { %v1203_v22 = vsub.f32 %v1957_v55, %v1185_v52 }
 0x6d2   :  { %v1657_v36 = vpop.eup %1656  ;;  %1220 = vst [vmem:[%s2056_s5 + $0x70] sm:$0xff] %v1204_v20 }
 0x6d3   :  { %1219 = vst [vmem:[%s2056_s5 + $0x68] sm:$0xff] %v1203_v22  ;;  %v1189_v39 = vmul.f32 0.6931472, %v1657_v36 }
 0x6d5   :  { %v1205_v23 = vsub.f32 %v1966_v62, %v1189_v39 }
 0x6d7   :  { %1221 = vst [vmem:[%s2056_s5 + $0x78] sm:$0xff] %v1205_v23 }

</bundles_post_ra>
